<compile_context>
chip_gen: v7x
topology: tpu7x:2x2x1
jax: 0.10.0
libtpu: 0.0.40
codegen_flags: <defaults>
</compile_context>

<pallas_src>
import functools

import jax
import jax.numpy as jnp
from jax.experimental import pallas as pl
from jax.experimental.pallas import tpu as pltpu

HIDDEN = 64


def _round_up(x, m):
    return ((x + m - 1) // m) * m


def _cdiv(a, b):
    return (a + b - 1) // b


def dqn_kernel(x_ref, w1_ref, w2_ref, w3_ref, b_ref, o_ref):
    """Transposed dataflow: all activations are (features, batch_tile)."""
    hidden = w1_ref.shape[0]      # 64
    a_pad = o_ref.shape[0]        # 8 (action dim padded to a sublane group)
    x = x_ref[...]                # (S, TB) bf16
    # fc1 + relu  (bf16 x bf16 -> f32 accumulate on the MXU)
    h1 = jnp.dot(w1_ref[...], x, preferred_element_type=jnp.float32)
    h1 = jnp.maximum(h1 + b_ref[0:hidden, 0:1], 0.0).astype(jnp.bfloat16)
    # fc2 + relu
    h2 = jnp.dot(w2_ref[...], h1, preferred_element_type=jnp.float32)
    h2 = jnp.maximum(h2 + b_ref[0:hidden, 1:2], 0.0).astype(jnp.bfloat16)
    # fc3 (no activation), lane-dense along the batch axis
    o = jnp.dot(w3_ref[...], h2, preferred_element_type=jnp.float32)
    o_ref[...] = (o + b_ref[0:a_pad, 2:3]).astype(o_ref.dtype)


def prepare_params(params):
    """One-time layout prep (hoisted out of the jitted forward).

    PyTorch Linear weights are (out, in), which is exactly the LHS needed for
    the transposed dataflow h = W @ x + b, so weights only need a bf16 cast.
    fc3 is zero-padded to 8 output rows (sublane-aligned output tile); the
    three biases are packed into a single (64, 4) f32 operand.
    """
    w1, b1, w2, b2, w3, b3 = params
    hidden = w1.shape[0]
    a = w3.shape[0]
    a_pad = _round_up(a, 8)
    w3p = jnp.zeros((a_pad, w3.shape[1]), jnp.float32).at[:a, :].set(w3)
    rows = max(hidden, a_pad)
    bpack = jnp.zeros((rows, 4), jnp.float32)
    bpack = bpack.at[:hidden, 0].set(b1).at[:hidden, 1].set(b2).at[:a, 2].set(b3)
    return (w1.astype(jnp.bfloat16),
            w2.astype(jnp.bfloat16),
            w3p.astype(jnp.bfloat16),
            bpack)


def _pick_batch_tile(batch, max_tile):
    if batch <= 256:
        return batch                      # one block == full batch (always legal)
    tb = min(max_tile, _round_up(batch, 128))
    if _cdiv(batch, tb) < 2:              # >=2 grid steps so v7x can use both TCs
        tb = _round_up(_cdiv(batch, 2), 128)
    return tb


@functools.partial(jax.jit, static_argnames=("action_size", "max_tile"))
def dqn_forward(x, w1, w2, w3p, bpack, *, action_size, max_tile=4096):
    batch, state = x.shape
    hidden = w1.shape[0]
    a_pad = w3p.shape[0]

    # Single fused XLA pass: (B, S) f32 -> (S, B) bf16 (batch on the lane axis).
    x_t = x.T.astype(jnp.bfloat16)

    tb = _pick_batch_tile(batch, max_tile)
    grid = (_cdiv(batch, tb),)            # last block may be ragged; OOB cols dropped

    full = lambda arr: pl.BlockSpec(arr.shape, lambda i: (0, 0))  # VMEM-resident

    flops = 2 * batch * (state * hidden + hidden * hidden + hidden * a_pad)
    bytes_accessed = (x_t.size * 2 + a_pad * batch * 4
                      + (w1.size + w2.size + w3p.size) * 2 + bpack.size * 4)

    out_t = pl.pallas_call(
        dqn_kernel,
        out_shape=jax.ShapeDtypeStruct((a_pad, batch), jnp.float32),
        grid=grid,
        in_specs=[
            pl.BlockSpec((state, tb), lambda i: (0, i)),   # x tile (pipelined)
            full(w1), full(w2), full(w3p), full(bpack),    # resident params
        ],
        out_specs=pl.BlockSpec((a_pad, tb), lambda i: (0, i)),
        compiler_params=pltpu.CompilerParams(
            dimension_semantics=("parallel",),
        ),
        cost_estimate=pl.CostEstimate(
            flops=flops, transcendentals=0, bytes_accessed=bytes_accessed),
    )(x_t, w1, w2, w3p, bpack)

    # Tiny (a_pad, B) -> (B, A) epilogue; no padded-output re-read.
    return out_t[:action_size, :].T


def init_params(key, state_size, action_size, hidden=HIDDEN):
    """PyTorch-style Linear init: w (out, in), b (out,), U(+/- 1/sqrt(fan_in))."""
    ks = jax.random.split(key, 6)

    def lin(kw, kb, fan_in, fan_out):
        bound = 1.0 / jnp.sqrt(jnp.float32(fan_in))
        w = jax.random.uniform(kw, (fan_out, fan_in), jnp.float32, -bound, bound)
        b = jax.random.uniform(kb, (fan_out,), jnp.float32, -bound, bound)
        return w, b

    w1, b1 = lin(ks[0], ks[1], state_size, hidden)
    w2, b2 = lin(ks[2], ks[3], hidden, hidden)
    w3, b3 = lin(ks[4], ks[5], hidden, action_size)
    return (w1, b1, w2, b2, w3, b3)


def dqn_reference(x, params):
    """Pure-JAX reference mirroring the kernel's bf16-operand / f32-accumulate math."""
    w1, b1, w2, b2, w3, b3 = params
    q = lambda a: a.astype(jnp.bfloat16).astype(jnp.float32)
    h1 = jnp.maximum(q(x) @ q(w1).T + b1, 0.0)
    h2 = jnp.maximum(q(h1) @ q(w2).T + b2, 0.0)
    return q(h2) @ q(w3).T + b3


if __name__ == "__main__":
    key = jax.random.PRNGKey(0)
    k_p, k_x1, k_x2 = jax.random.split(key, 3)

    state_size, action_size = 16, 4
    params = init_params(k_p, state_size, action_size)
    kparams = prepare_params(params)   # one-time layout prep (outside forward)

    # Small batch: single grid step, block == full batch.
    x_small = jax.random.normal(k_x1, (8, state_size), jnp.float32)
    out_small = jax.block_until_ready(
        dqn_forward(x_small, *kparams, action_size=action_size))
    ref_small = dqn_reference(x_small, params)
    assert out_small.shape == (8, action_size)
    assert jnp.allclose(out_small, ref_small, atol=2e-3, rtol=2e-3)

    # Larger batch: 2-step grid with a ragged last tile (300 = 256 + 44).
    x_big = jax.random.normal(k_x2, (300, state_size), jnp.float32)
    out_big = jax.block_until_ready(
        dqn_forward(x_big, *kparams, action_size=action_size))
    ref_big = dqn_reference(x_big, params)
    assert out_big.shape == (300, action_size)
    assert jnp.allclose(out_big, ref_big, atol=2e-3, rtol=2e-3)

    print("KERNEL_OK")
</pallas_src>

<mosaic_0001>
module attributes {stable_mosaic.version = 11 : i64} {
  func.func @dqn_kernel(%arg0: i32, %arg1: memref<16x8xbf16, #tpu.memory_space<vmem>>, %arg2: memref<64x16xbf16, #tpu.memory_space<vmem>>, %arg3: memref<64x64xbf16, #tpu.memory_space<vmem>>, %arg4: memref<8x64xbf16, #tpu.memory_space<vmem>>, %arg5: memref<64x4xf32, #tpu.memory_space<vmem>>, %arg6: memref<8x8xf32, #tpu.memory_space<vmem>>) attributes {dimension_semantics = [#tpu.dimension_semantics<parallel>], iteration_bounds = array<i64: 1>, scalar_prefetch = 0 : i64, scratch_operands = 0 : i64, tpu.core_type = #tpu.core_type<tc>, window_params = [{transform_indices = @transform_0, window_bounds = array<i64: 16, 8>}, {pipeline_mode = #tpu.pipeline_mode<synchronous>, transform_indices = @transform_1, window_bounds = array<i64: 64, 16>}, {pipeline_mode = #tpu.pipeline_mode<synchronous>, transform_indices = @transform_2, window_bounds = array<i64: 64, 64>}, {pipeline_mode = #tpu.pipeline_mode<synchronous>, transform_indices = @transform_3, window_bounds = array<i64: 8, 64>}, {pipeline_mode = #tpu.pipeline_mode<synchronous>, transform_indices = @transform_4, window_bounds = array<i64: 64, 4>}, {transform_indices = @transform_5, window_bounds = array<i64: 8, 8>}]} {
    %c0 = arith.constant 0 : index
    %c0_0 = arith.constant 0 : index
    %0 = vector.load %arg1[%c0, %c0_0] : memref<16x8xbf16, #tpu.memory_space<vmem>>, vector<16x8xbf16>
    %c0_1 = arith.constant 0 : index
    %c0_2 = arith.constant 0 : index
    %1 = vector.load %arg2[%c0_1, %c0_2] : memref<64x16xbf16, #tpu.memory_space<vmem>>, vector<64x16xbf16>
    %cst = arith.constant dense<0.000000e+00> : vector<64x8xf32>
    %2 = tpu.matmul %1, %0, %cst {dimension_numbers = #tpu.dot_dimension_numbers<[1], [0], [0], [1], [0, 0, 1, 1], [], []>} : vector<64x16xbf16>, vector<16x8xbf16>, vector<64x8xf32> -> vector<64x8xf32>
    %c0_3 = arith.constant 0 : index
    %c0_4 = arith.constant 0 : index
    %3 = vector.load %arg5[%c0_3, %c0_4] : memref<64x4xf32, #tpu.memory_space<vmem>>, vector<64x1xf32>
    %4 = vector.broadcast %3 : vector<64x1xf32> to vector<64x8xf32>
    %5 = arith.addf %2, %4 : vector<64x8xf32>
    %cst_5 = arith.constant 0.000000e+00 : f32
    %6 = vector.broadcast %cst_5 : f32 to vector<64x8xf32>
    %7 = arith.maximumf %5, %6 : vector<64x8xf32>
    %8 = arith.truncf %7 : vector<64x8xf32> to vector<64x8xbf16>
    %c0_6 = arith.constant 0 : index
    %c0_7 = arith.constant 0 : index
    %9 = vector.load %arg3[%c0_6, %c0_7] : memref<64x64xbf16, #tpu.memory_space<vmem>>, vector<64x64xbf16>
    %cst_8 = arith.constant dense<0.000000e+00> : vector<64x8xf32>
    %10 = tpu.matmul %9, %8, %cst_8 {dimension_numbers = #tpu.dot_dimension_numbers<[1], [0], [0], [1], [0, 0, 1, 1], [], []>} : vector<64x64xbf16>, vector<64x8xbf16>, vector<64x8xf32> -> vector<64x8xf32>
    %c0_9 = arith.constant 0 : index
    %c1 = arith.constant 1 : index
    %11 = vector.load %arg5[%c0_9, %c1] : memref<64x4xf32, #tpu.memory_space<vmem>>, vector<64x1xf32>
    %12 = vector.broadcast %11 : vector<64x1xf32> to vector<64x8xf32>
    %13 = arith.addf %10, %12 : vector<64x8xf32>
    %cst_10 = arith.constant 0.000000e+00 : f32
    %14 = vector.broadcast %cst_10 : f32 to vector<64x8xf32>
    %15 = arith.maximumf %13, %14 : vector<64x8xf32>
    %16 = arith.truncf %15 : vector<64x8xf32> to vector<64x8xbf16>
    %c0_11 = arith.constant 0 : index
    %c0_12 = arith.constant 0 : index
    %17 = vector.load %arg4[%c0_11, %c0_12] : memref<8x64xbf16, #tpu.memory_space<vmem>>, vector<8x64xbf16>
    %cst_13 = arith.constant dense<0.000000e+00> : vector<8x8xf32>
    %18 = tpu.matmul %17, %16, %cst_13 {dimension_numbers = #tpu.dot_dimension_numbers<[1], [0], [0], [1], [0, 0, 1, 1], [], []>} : vector<8x64xbf16>, vector<64x8xbf16>, vector<8x8xf32> -> vector<8x8xf32>
    %c0_14 = arith.constant 0 : index
    %c2 = arith.constant 2 : index
    %19 = vector.load %arg5[%c0_14, %c2] : memref<64x4xf32, #tpu.memory_space<vmem>>, vector<8x1xf32>
    %20 = vector.broadcast %19 : vector<8x1xf32> to vector<8x8xf32>
    %21 = arith.addf %18, %20 : vector<8x8xf32>
    %c0_15 = arith.constant 0 : index
    %c0_16 = arith.constant 0 : index
    %22 = vector.load %arg6[%c0_15, %c0_16] : memref<8x8xf32, #tpu.memory_space<vmem>>, vector<8x8xf32>
    tpu.vector_store %arg6[%c0_15, %c0_16], %21 {strides = array<i32>} : memref<8x8xf32, #tpu.memory_space<vmem>>, vector<8x8xf32>,
    return
  }
  func.func @transform_0(%arg0: i32) -> (i32, i32) {
    %c0_i32 = arith.constant 0 : i32
    %c0_i32_0 = arith.constant 0 : i32
    return %c0_i32, %arg0 : i32, i32
  }
  func.func @transform_1(%arg0: i32) -> (i32, i32) {
    %c0_i32 = arith.constant 0 : i32
    %c0_i32_0 = arith.constant 0 : i32
    %c0_i32_1 = arith.constant 0 : i32
    return %c0_i32, %c0_i32_0 : i32, i32
  }
  func.func @transform_2(%arg0: i32) -> (i32, i32) {
    %c0_i32 = arith.constant 0 : i32
    %c0_i32_0 = arith.constant 0 : i32
    %c0_i32_1 = arith.constant 0 : i32
    return %c0_i32, %c0_i32_0 : i32, i32
  }
  func.func @transform_3(%arg0: i32) -> (i32, i32) {
    %c0_i32 = arith.constant 0 : i32
    %c0_i32_0 = arith.constant 0 : i32
    %c0_i32_1 = arith.constant 0 : i32
    return %c0_i32, %c0_i32_0 : i32, i32
  }
  func.func @transform_4(%arg0: i32) -> (i32, i32) {
    %c0_i32 = arith.constant 0 : i32
    %c0_i32_0 = arith.constant 0 : i32
    %c0_i32_1 = arith.constant 0 : i32
    return %c0_i32, %c0_i32_0 : i32, i32
  }
  func.func @transform_5(%arg0: i32) -> (i32, i32) {
    %c0_i32 = arith.constant 0 : i32
    %c0_i32_0 = arith.constant 0 : i32
    return %c0_i32, %arg0 : i32, i32
  }
}

</mosaic_0001>

<bundles_post_ra>
// kernel: dqn_forward.1
= control target key start
LH: loop header
LB: loop body
LE: loop exit
PB: predicated region body
PF: predicated region fallthrough
CT: control target
= control target key end

     0   :  { %vm105_vm0 = vcmask 130048   ;;  %v495_v1 = vmov 0   ;;  %vm255_vm1 = vcmask 523264   ;;  %v496_v15 = vmov 1   ;;  %s601_s0 = inlined_call_operand.vmem [shape: bf16[16,8], index: 0, kind: input, shape index: {}]   ;;  %s602_s1 = inlined_call_operand.vmem [shape: bf16[64,16], index: 1, kind: input, shape index: {}]   ;;  %s603_s4 = inlined_call_operand.vmem [shape: f32[64,4], index: 4, kind: input, shape index: {}]   ;;  %s604_s2 = inlined_call_operand.vmem [shape: bf16[64,64], index: 2, kind: input, shape index: {}]   ;;  %s605_s3 = inlined_call_operand.vmem [shape: bf16[8,64], index: 3, kind: input, shape index: {}]   ;;  %s606_s5 = inlined_call_operand.vmem [shape: f32[8,8], index: 5, kind: output, shape index: {}]  }
   0x1   :  { %v486_v0 = vld [vmem:[%s601_s0] sm:$0xff]   ;;  %480 = vset.pattern.permute.xlu0 %v495_v1  ;;  %481 = vset.pattern.permute.xlu1 %v495_v1  ;;  %v488_v3 = vld [vmem:[%s602_s1 + $0x8] sm:$0xff]   ;;  %v489_v4 = vld [vmem:[%s602_s1 + $0x10] sm:$0xff]   ;;  %v497_v55 = vmov 0.0   ;;  %vm498_vm2 = vmmov 0   ;;  %v499_v56 = vmov 2  }
   0x2   :  { %v487_v2 = vld [vmem:[%s602_s1] sm:$0xff]   ;;  %437 = vmatprep.subr.bf16.mxu0 %v486_v0  ;;  %v33_v6 = vld [vmem:[%s603_s4 + $0x10] sm:$0xff]  ;;  %v32_v7 = vld [vmem:[%s603_s4 + $0x8] sm:$0xff]  ;;  %vm395_vm3 = vcmask 64512  }
   0x3   :  { %438 = vmatpush3.bf16.msra.mxu0 %v486_v0  ;;  %439 = vmatprep.mubr.msk.bf16.mxu0 %vm105_vm0, %v487_v2  ;;  %v546_v5 = vld [vmem:[%s603_s4] sm:$0xff]  ;;  %v34_v8 = vld [vmem:[%s603_s4 + $0x18] sm:$0xff]  ;;  %v36_v11 = vld [vmem:[%s603_s4 + $0x28] sm:$0xff] }
   0x4   :  { %41 = vperm.xlu0 %480, %v546_v5   ;;  %51 = vperm.xlu1 %481, %v33_v6   ;;  %v490_v9 = vld [vmem:[%s602_s1 + $0x18] sm:$0xff]   ;;  %v35_v10 = vld [vmem:[%s603_s4 + $0x20] sm:$0xff]  ;;  %v37_v12 = vld [vmem:[%s603_s4 + $0x30] sm:$0xff] }
   0x5   :  { %v38_v13 = vld [vmem:[%s603_s4 + $0x38] sm:$0xff]  ;;  %v491_v14 = vld [vmem:[%s604_s2] sm:$0xff]   ;;  %v492_v52 = vld [vmem:[%s604_s2 + $0x8] sm:$0xff]   ;;  %463 = vmatprep.subr.bf16.mxu0 %v497_v55 }
   0x6   :  { %440 = vmatmul.mubr.msk.bf16.vlgmr.msra.gmra.mrb[0].mxu0 %vm105_vm0, %v488_v3  ;;  %455 = vmatprep.mubr.msk.bf16.mxu1 %vm255_vm1, %v491_v14  ;;  %v493_v53 = vld [vmem:[%s604_s2 + $0x10] sm:$0xff]   ;;  %v494_v54 = vld [vmem:[%s604_s2 + $0x18] sm:$0xff]  }
   0x7   :  { %443 = vmatprep.mubr.msk.bf16.mxu0 %vm105_vm0, %v489_v4 }
   0x8   :  { %46 = vperm.xlu0 %480, %v32_v7   ;;  %56 = vperm.xlu1 %481, %v34_v8  }
   0xc   :  { %61 = vperm.xlu0 %480, %v35_v10   ;;  %66 = vperm.xlu1 %481, %v36_v11  }
   0xe   :  { %444 = vmatmul.mubr.msk.bf16.gmra.mrb[4].mxu0 %vm105_vm0, %v490_v9 }
   0xf   :  { %471 = vmatprep.mubr.msk.bf16.mxu0 %vm498_vm2, %v497_v55 }
  0x10   :  { %71 = vperm.xlu0 %480, %v37_v12   ;;  %76 = vperm.xlu1 %481, %v38_v13  }
  0x14   :  { %483 = vset.pattern.permute.xlu1 %v496_v15  ;;  %482 = vset.pattern.permute.xlu0 %v496_v15 }
  0x15   :  { %208 = vperm.xlu1 %483, %v32_v7   ;;  %204 = vperm.xlu0 %482, %v546_v5  }
  0x19   :  { %212 = vperm.xlu1 %483, %v33_v6   ;;  %216 = vperm.xlu0 %482, %v34_v8  }
  0x1d   :  { %220 = vperm.xlu1 %483, %v35_v10   ;;  %224 = vperm.xlu0 %482, %v36_v11  }
  0x21   :  { %228 = vperm.xlu1 %483, %v37_v12   ;;  %232 = vperm.xlu0 %482, %v38_v13  }
  0x25   :  { %484 = vset.pattern.permute.xlu1 %v499_v56  ;;  %485 = vset.pattern.permute.xlu0 %v499_v56 }
  0x26   :  { %349 = vperm.xlu1 %484, %v546_v5  }
  0x83   :  { %v42_v16 = vpop.permute.xlu0 %41  ;;  %v52_v17 = vpop.permute.xlu1 %51 }
  0x87   :  { %v47_v18 = vpop.permute.xlu0 %46  ;;  %v57_v19 = vpop.permute.xlu1 %56 }
  0x8b   :  { %v62_v23 = vpop.permute.xlu0 %61  ;;  %v67_v28 = vpop.permute.xlu1 %66 }
  0x8f   :  { %v72_v35 = vpop.permute.xlu0 %71  ;;  %v77_v40 = vpop.permute.xlu1 %76 }
  0x94   :  { %v209_v57 = vpop.permute.xlu1 %208  ;;  %v205_v58 = vpop.permute.xlu0 %204 }
  0x98   :  { %v213_v59 = vpop.permute.xlu1 %212  ;;  %v217_v60 = vpop.permute.xlu0 %216 }
  0x9c   :  { %v221_v0 = vpop.permute.xlu1 %220  ;;  %v225_v6 = vpop.permute.xlu0 %224 }
  0xa0   :  { %v229_v5 = vpop.permute.xlu1 %228 }
  0xd9   :  { %v441_v20 = vpop.f32.mrb[0].mxu0 }
  0xda   :  { %v161_v21 = vadd.f32 %v441_v20, %v52_v17  ;;  %v152_v22 = vpop.f32.mrb[1].mxu0  ;;  %v233_v17 = vpop.permute.xlu0 %232 }
  0xdb   :  { %v153_v24 = vadd.f32 %v152_v22, %v42_v16  ;;  %v442_v25 = vpop.f32.mrb[2].mxu0 }
  0xdc   :  { %v164_v26 = vadd.f32 %v442_v25, %v57_v19  ;;  %v155_v27 = vpop.f32.mrb[3].mxu0  ;;  %v185_v30 = vmax.f32 %v161_v21, 0.0 }
  0xdd   :  { %v156_v29 = vadd.f32 %v155_v27, %v47_v18  ;;  %v183_v32 = vmax.f32 %v153_v24, 0.0 }
  0xde   :  { %v186_v31 = vmax.f32 %v164_v26, 0.0 }
  0xdf   :  { %v184_v33 = vmax.f32 %v156_v29, 0.0  ;;  %v345_v29 = vld [vmem:[%s605_s3] sm:$0xf] }
  0xe0   :  { %v192_v34 = vpack.c.bf16 %v186_v31, %v185_v30  ;;  %v350_v30 = vpop.permute.xlu1 %349 }
  0xe1   :  { %v445_v36 = vpop.f32.mrb[4].mxu0  ;;  %v191_v37 = vpack.c.bf16 %v184_v33, %v183_v32 }
  0xe2   :  { %v177_v38 = vadd.f32 %v445_v36, %v72_v35  ;;  %v168_v39 = vpop.f32.mrb[5].mxu0 }
  0xe3   :  { %v169_v41 = vadd.f32 %v168_v39, %v62_v23  ;;  %v446_v42 = vpop.f32.mrb[6].mxu0  ;;  %447 = vmatprep.subr.bf16.mxu1 %v191_v37 }
  0xe4   :  { %v180_v43 = vadd.f32 %v446_v42, %v77_v40  ;;  %v171_v44 = vpop.f32.mrb[7].mxu0  ;;  %448 = vmatpush3.bf16.msra.mxu1 %v191_v37  ;;  %v189_v46 = vmax.f32 %v177_v38, 0.0 }
  0xe5   :  { %v172_v45 = vadd.f32 %v171_v44, %v67_v28  ;;  %449 = vmatprep.subr.bf16.mxu1 %v192_v34  ;;  %v187_v48 = vmax.f32 %v169_v41, 0.0 }
  0xe6   :  { %v190_v47 = vmax.f32 %v180_v43, 0.0 }
  0xe7   :  { %v188_v49 = vmax.f32 %v172_v45, 0.0 }
  0xe8   :  { %v194_v50 = vpack.c.bf16 %v190_v47, %v189_v46  ;;  %450 = vmatpush3.bf16.msra.mxu1 %v192_v34 }
  0xe9   :  { %v193_v51 = vpack.c.bf16 %v188_v49, %v187_v48 }
  0xeb   :  { %451 = vmatprep.subr.bf16.mxu1 %v193_v51 }
  0xec   :  { %452 = vmatpush3.bf16.msra.mxu1 %v193_v51 }
  0xed   :  { %453 = vmatprep.subr.bf16.mxu1 %v194_v50 }
  0xf0   :  { %454 = vmatpush3.bf16.msra.mxu1 %v194_v50 }
  0xf3   :  { %456 = vmatmul.mubr.msk.bf16.vlgmr.msra.gmra.mrb[0].mxu1 %vm255_vm1, %v492_v52 }
  0xf4   :  { %459 = vmatprep.mubr.msk.bf16.mxu1 %vm255_vm1, %v493_v53 }
  0xfb   :  { %460 = vmatmul.mubr.msk.bf16.gmra.mrb[4].mxu1 %vm255_vm1, %v494_v54 }
 0x1c6   :  { %v457_v61 = vpop.f32.mrb[0].mxu1 }
 0x1c7   :  { %v311_v62 = vadd.f32 %v457_v61, %v213_v59  ;;  %v302_v63 = vpop.f32.mrb[1].mxu1 }
 0x1c8   :  { %v303_v1 = vadd.f32 %v302_v63, %v205_v58  ;;  %v458_v2 = vpop.f32.mrb[2].mxu1 }
 0x1c9   :  { %v314_v3 = vadd.f32 %v458_v2, %v217_v60  ;;  %v305_v4 = vpop.f32.mrb[3].mxu1  ;;  %v335_v8 = vmax.f32 %v311_v62, 0.0 }
 0x1ca   :  { %v306_v7 = vadd.f32 %v305_v4, %v209_v57  ;;  %v333_v10 = vmax.f32 %v303_v1, 0.0 }
 0x1cb   :  { %v336_v9 = vmax.f32 %v314_v3, 0.0 }
 0x1cc   :  { %v334_v11 = vmax.f32 %v306_v7, 0.0 }
 0x1cd   :  { %v342_v12 = vpack.c.bf16 %v336_v9, %v335_v8 }
 0x1ce   :  { %v341_v13 = vpack.c.bf16 %v334_v11, %v333_v10  ;;  %v461_v14 = vpop.f32.mrb[4].mxu1 }
 0x1cf   :  { %v327_v15 = vadd.f32 %v461_v14, %v229_v5  ;;  %v318_v16 = vpop.f32.mrb[5].mxu1 }
 0x1d0   :  { %v319_v18 = vadd.f32 %v318_v16, %v221_v0  ;;  %v462_v19 = vpop.f32.mrb[6].mxu1  ;;  %464 = vmatpush3.bf16.msra.mxu0 %v341_v13 }
 0x1d1   :  { %v330_v20 = vadd.f32 %v462_v19, %v233_v17  ;;  %v321_v21 = vpop.f32.mrb[7].mxu1  ;;  %465 = vmatprep.subr.bf16.mxu0 %v497_v55  ;;  %v339_v23 = vmax.f32 %v327_v15, 0.0 }
 0x1d2   :  { %v322_v22 = vadd.f32 %v321_v21, %v225_v6  ;;  %v337_v25 = vmax.f32 %v319_v18, 0.0 }
 0x1d3   :  { %v340_v24 = vmax.f32 %v330_v20, 0.0 }
 0x1d4   :  { %v338_v26 = vmax.f32 %v322_v22, 0.0  ;;  %466 = vmatpush3.bf16.msra.mxu0 %v342_v12 }
 0x1d5   :  { %v344_v27 = vpack.c.bf16 %v340_v24, %v339_v23  ;;  %467 = vmatprep.subr.bf16.mxu0 %v497_v55 }
 0x1d6   :  { %v343_v28 = vpack.c.bf16 %v338_v26, %v337_v25 }
 0x1d8   :  { %468 = vmatpush3.bf16.msra.mxu0 %v343_v28 }
 0x1d9   :  { %469 = vmatprep.subr.bf16.mxu0 %v497_v55 }
 0x1dc   :  { %470 = vmatpush3.bf16.msra.mxu0 %v344_v27 }
 0x1df   :  { %472 = vmatmul.mubr.msk.bf16.vlgmr.msra.gmra.mrb[8].mxu0 %vm255_vm1, %v345_v29 }
 0x2b2   :  { %v389_v31 = vpop.f32.mrb[8].mxu0 }
 0x2b3   :  { %v390_v32 = vadd.f32 %v389_v31, %v350_v30  ;;  %v473_v33 = vpop.f32.mrb[9].mxu0 }
 0x2b4   :  { %v392_v34 = vpop.f32.mrb[10].mxu0 }
 0x2b5   :  { %396 = vst.msk [vmem:[%s606_s5] sm:$0xff] %vm395_vm3, %v390_v32  ;;  %v474_v35 = vpop.f32.mrb[11].mxu0 }

</bundles_post_ra>
